<compile_context>
chip_gen: v7x
topology: tpu7x:2x2x1
jax: 0.10.0
libtpu: 0.0.40
codegen_flags: <defaults>
</compile_context>

<pallas_src>
import math

import jax
import jax.numpy as jnp
from jax.experimental import pallas as pl
from jax.experimental.pallas import tpu as pltpu

# Small, forward-consistent config (hidden divisible by heads; rotary_dim == head_dim).
BATCH = 2
SEQ = 16
HIDDEN = 128
NUM_HEADS = 4
HEAD_DIM = HIDDEN // NUM_HEADS  # 32


def lunar_attention_kernel(x_ref, wf_ref, wo_ref, cos_ref, sin_ref, mask_ref, o_ref):
    x = x_ref[0]              # (S, H)
    wf = wf_ref[...]          # (H, 5H) fused, pre-transposed, scale & rotate_half folded
    wo_t = wo_ref[...]        # (H, H)  pre-transposed output projection
    cos = cos_ref[...]        # (S, H)  head-tiled rotary cos
    sin = sin_ref[...]        # (S, H)  head-tiled rotary sin
    mask = mask_ref[...]      # (S, S)  additive causal mask (0 / -1e30)

    s_len, hidden = x.shape

    # Single fused MXU matmul: q, k, v, rotate_half(q), rotate_half(k).
    proj = jnp.dot(x, wf, preferred_element_type=jnp.float32)   # (S, 5H)
    q = proj[:, 0 * hidden:1 * hidden]
    k = proj[:, 1 * hidden:2 * hidden]
    v = proj[:, 2 * hidden:3 * hidden]
    q_rot = proj[:, 3 * hidden:4 * hidden]
    k_rot = proj[:, 4 * hidden:5 * hidden]

    # Full-width, lane-dense rotary embedding (scale already folded into q cols).
    q = q * cos + q_rot * sin
    k = k * cos + k_rot * sin

    # Causal softmax attention per head; head-concat folded into the output
    # projection by accumulating against 32-row slices of wo^T.
    acc = jnp.zeros((s_len, hidden), jnp.float32)
    dn = (((1,), (1,)), ((), ()))     # contract last dims of qh/kh (no transpose)
    for h in range(NUM_HEADS):        # static unroll over heads
        lo = h * HEAD_DIM
        qh = q[:, lo:lo + HEAD_DIM]
        kh = k[:, lo:lo + HEAD_DIM]
        vh = v[:, lo:lo + HEAD_DIM]

        scores = jax.lax.dot_general(qh, kh, dn,
                                     preferred_element_type=jnp.float32)  # (S, S)
        scores = scores + mask
        m = jnp.max(scores, axis=-1, keepdims=True)
        p = jnp.exp(scores - m)
        l = jnp.sum(p, axis=-1, keepdims=True)
        p = p * pl.reciprocal(l, approx=True)

        out_h = jnp.dot(p, vh, preferred_element_type=jnp.float32)        # (S, d)
        acc = acc + jnp.dot(out_h, wo_t[lo:lo + HEAD_DIM, :],
                            preferred_element_type=jnp.float32)
    o_ref[0] = acc


def lunar_attention(x, w_fused, wo_t, cos_full, sin_full, add_mask):
    B, S, H = x.shape
    return pl.pallas_call(
        lunar_attention_kernel,
        out_shape=jax.ShapeDtypeStruct((B, S, H), jnp.float32),
        grid=(B,),
        in_specs=[
            pl.BlockSpec((1, S, H), lambda b: (b, 0, 0)),
            pl.BlockSpec((H, 5 * H), lambda b: (0, 0)),
            pl.BlockSpec((H, H), lambda b: (0, 0)),
            pl.BlockSpec((S, H), lambda b: (0, 0)),
            pl.BlockSpec((S, H), lambda b: (0, 0)),
            pl.BlockSpec((S, S), lambda b: (0, 0)),
        ],
        out_specs=pl.BlockSpec((1, S, H), lambda b: (b, 0, 0)),
        compiler_params=pltpu.CompilerParams(
            dimension_semantics=("parallel",)),
    )(x, w_fused, wo_t, cos_full, sin_full, add_mask)


# ---------------- host-side (free) preprocessing -----------------------------

def rotate_half_matrix(d):
    """R such that x @ R == rotate_half(x) for a d-dim per-head vector."""
    half = d // 2
    eye = jnp.eye(half, dtype=jnp.float32)
    r = jnp.zeros((d, d), jnp.float32)
    r = r.at[half:, :half].set(-eye)   # (x @ R)[j<half]  = -x[j+half]
    r = r.at[:half, half:].set(eye)    # (x @ R)[j>=half] =  x[j-half]
    return r


def pack_weights(wq, wk, wv, wo):
    """Pre-transpose, fold scale + rotate_half into a fused (H, 5H) weight."""
    d = HEAD_DIM
    scale = 1.0 / math.sqrt(d)
    p = jnp.kron(jnp.eye(NUM_HEADS, dtype=jnp.float32), rotate_half_matrix(d))  # (H, H)
    wq_t = wq.T * scale
    wk_t = wk.T
    wv_t = wv.T
    w_fused = jnp.concatenate([wq_t, wk_t, wv_t, wq_t @ p, wk_t @ p], axis=1)   # (H, 5H)
    return w_fused, wo.T


def rotary_tables(seq_len, dim):
    # Mirrors RotaryEmbedding.__init__ caches (sliced to seq_len).
    inv_freq = 1.0 / (10000.0 ** (jnp.arange(0, dim, 2, dtype=jnp.float32) / dim))
    t = jnp.arange(seq_len, dtype=jnp.float32)
    freqs = jnp.einsum('i,j->ij', t, inv_freq)
    emb = jnp.concatenate([freqs, freqs], axis=-1)   # (S, dim)
    return jnp.cos(emb), jnp.sin(emb)


def causal_additive_mask(seq_len):
    row = jnp.arange(seq_len)[:, None]
    col = jnp.arange(seq_len)[None, :]
    return jnp.where(col <= row, 0.0, -1e30).astype(jnp.float32)


# ---------------- pure-JAX reference (module semantics) ----------------------

def reference(x, wq, wk, wv, wo, cos, sin):
    B, S, H = x.shape
    d = HEAD_DIM
    q = x @ wq.T
    k = x @ wk.T
    v = x @ wv.T

    def split(t):
        return t.reshape(B, S, NUM_HEADS, d).transpose(0, 2, 1, 3)

    q, k, v = split(q), split(k), split(v)

    def rot_half(t):
        return jnp.concatenate([-t[..., d // 2:], t[..., :d // 2]], axis=-1)

    c = cos[None, None]
    s = sin[None, None]
    q = q * c + rot_half(q) * s
    k = k * c + rot_half(k) * s
    scores = jnp.einsum('bhqd,bhkd->bhqk', q, k) / math.sqrt(d)
    mask = jnp.tril(jnp.ones((S, S), dtype=bool))
    scores = jnp.where(mask, scores, -1e30)
    probs = jax.nn.softmax(scores, axis=-1)
    out = jnp.einsum('bhqk,bhkd->bhqd', probs, v)
    out = out.transpose(0, 2, 1, 3).reshape(B, S, H)
    return out @ wo.T


if __name__ == "__main__":
    key = jax.random.PRNGKey(0)
    kx, kq, kk, kv, ko = jax.random.split(key, 5)

    initializer_range = 0.02
    hidden_states = jax.random.normal(kx, (BATCH, SEQ, HIDDEN), dtype=jnp.float32)
    wq = jax.random.normal(kq, (HIDDEN, HIDDEN), dtype=jnp.float32) * initializer_range
    wk = jax.random.normal(kk, (HIDDEN, HIDDEN), dtype=jnp.float32) * initializer_range
    wv = jax.random.normal(kv, (HIDDEN, HIDDEN), dtype=jnp.float32) * initializer_range
    wo = jax.random.normal(ko, (HIDDEN, HIDDEN), dtype=jnp.float32) * initializer_range

    cos, sin = rotary_tables(SEQ, HEAD_DIM)

    # Host-side (free) preprocessing of static parameters.
    w_fused, wo_t = pack_weights(wq, wk, wv, wo)
    cos_full = jnp.tile(cos, (1, NUM_HEADS))          # (S, H) lane-dense
    sin_full = jnp.tile(sin, (1, NUM_HEADS))
    add_mask = causal_additive_mask(SEQ)              # (S, S)

    out = lunar_attention(hidden_states, w_fused, wo_t, cos_full, sin_full, add_mask)
    out = jax.block_until_ready(out)

    ref = reference(hidden_states, wq, wk, wv, wo, cos, sin)
    assert out.shape == (BATCH, SEQ, HIDDEN)
    assert jnp.allclose(out, ref, atol=1e-3, rtol=1e-3), "mismatch vs reference"

    print("KERNEL_OK")
</pallas_src>

<mosaic_0001>
module attributes {stable_mosaic.version = 11 : i64} {
  func.func @lunar_attention_kernel(%arg0: i32, %arg1: memref<1x16x128xf32, #tpu.memory_space<vmem>>, %arg2: memref<128x640xf32, #tpu.memory_space<vmem>>, %arg3: memref<128x128xf32, #tpu.memory_space<vmem>>, %arg4: memref<16x128xf32, #tpu.memory_space<vmem>>, %arg5: memref<16x128xf32, #tpu.memory_space<vmem>>, %arg6: memref<16x16xf32, #tpu.memory_space<vmem>>, %arg7: memref<1x16x128xf32, #tpu.memory_space<vmem>>) attributes {dimension_semantics = [#tpu.dimension_semantics<parallel>], iteration_bounds = array<i64: 2>, scalar_prefetch = 0 : i64, scratch_operands = 0 : i64, tpu.core_type = #tpu.core_type<tc>, window_params = [{transform_indices = @transform_0, window_bounds = array<i64: 1, 16, 128>}, {pipeline_mode = #tpu.pipeline_mode<synchronous>, transform_indices = @transform_1, window_bounds = array<i64: 128, 640>}, {pipeline_mode = #tpu.pipeline_mode<synchronous>, transform_indices = @transform_2, window_bounds = array<i64: 128, 128>}, {pipeline_mode = #tpu.pipeline_mode<synchronous>, transform_indices = @transform_3, window_bounds = array<i64: 16, 128>}, {pipeline_mode = #tpu.pipeline_mode<synchronous>, transform_indices = @transform_4, window_bounds = array<i64: 16, 128>}, {pipeline_mode = #tpu.pipeline_mode<synchronous>, transform_indices = @transform_5, window_bounds = array<i64: 16, 16>}, {transform_indices = @transform_6, window_bounds = array<i64: 1, 16, 128>}]} {
    %c0 = arith.constant 0 : index
    %c0_0 = arith.constant 0 : index
    %c0_1 = arith.constant 0 : index
    %0 = vector.load %arg1[%c0, %c0_0, %c0_1] : memref<1x16x128xf32, #tpu.memory_space<vmem>>, vector<1x16x128xf32>
    %1 = vector.shape_cast %0 : vector<1x16x128xf32> to vector<16x128xf32>
    %c0_2 = arith.constant 0 : index
    %c0_3 = arith.constant 0 : index
    %2 = vector.load %arg2[%c0_2, %c0_3] : memref<128x640xf32, #tpu.memory_space<vmem>>, vector<128x640xf32>
    %c0_4 = arith.constant 0 : index
    %c0_5 = arith.constant 0 : index
    %3 = vector.load %arg3[%c0_4, %c0_5] : memref<128x128xf32, #tpu.memory_space<vmem>>, vector<128x128xf32>
    %c0_6 = arith.constant 0 : index
    %c0_7 = arith.constant 0 : index
    %4 = vector.load %arg4[%c0_6, %c0_7] : memref<16x128xf32, #tpu.memory_space<vmem>>, vector<16x128xf32>
    %c0_8 = arith.constant 0 : index
    %c0_9 = arith.constant 0 : index
    %5 = vector.load %arg5[%c0_8, %c0_9] : memref<16x128xf32, #tpu.memory_space<vmem>>, vector<16x128xf32>
    %c0_10 = arith.constant 0 : index
    %c0_11 = arith.constant 0 : index
    %6 = vector.load %arg6[%c0_10, %c0_11] : memref<16x16xf32, #tpu.memory_space<vmem>>, vector<16x16xf32>
    %cst = arith.constant dense<0.000000e+00> : vector<16x640xf32>
    %7 = tpu.matmul %1, %2, %cst {dimension_numbers = #tpu.dot_dimension_numbers<[1], [0], [0], [1], [0, 0, 1, 1], [], []>} : vector<16x128xf32>, vector<128x640xf32>, vector<16x640xf32> -> vector<16x640xf32>
    %8 = vector.extract_strided_slice %7 {offsets = [0, 0], sizes = [16, 128], strides = [1, 1]} : vector<16x640xf32> to vector<16x128xf32>
    %9 = vector.extract_strided_slice %7 {offsets = [0, 128], sizes = [16, 128], strides = [1, 1]} : vector<16x640xf32> to vector<16x128xf32>
    %10 = vector.extract_strided_slice %7 {offsets = [0, 256], sizes = [16, 128], strides = [1, 1]} : vector<16x640xf32> to vector<16x128xf32>
    %11 = vector.extract_strided_slice %7 {offsets = [0, 384], sizes = [16, 128], strides = [1, 1]} : vector<16x640xf32> to vector<16x128xf32>
    %12 = vector.extract_strided_slice %7 {offsets = [0, 512], sizes = [16, 128], strides = [1, 1]} : vector<16x640xf32> to vector<16x128xf32>
    %13 = arith.mulf %8, %4 : vector<16x128xf32>
    %14 = arith.mulf %11, %5 : vector<16x128xf32>
    %15 = arith.addf %13, %14 : vector<16x128xf32>
    %16 = arith.mulf %9, %4 : vector<16x128xf32>
    %17 = arith.mulf %12, %5 : vector<16x128xf32>
    %18 = arith.addf %16, %17 : vector<16x128xf32>
    %cst_12 = arith.constant 0.000000e+00 : f32
    %19 = vector.broadcast %cst_12 : f32 to vector<16x128xf32>
    %20 = vector.extract_strided_slice %15 {offsets = [0, 0], sizes = [16, 32], strides = [1, 1]} : vector<16x128xf32> to vector<16x32xf32>
    %21 = vector.extract_strided_slice %18 {offsets = [0, 0], sizes = [16, 32], strides = [1, 1]} : vector<16x128xf32> to vector<16x32xf32>
    %22 = vector.extract_strided_slice %10 {offsets = [0, 0], sizes = [16, 32], strides = [1, 1]} : vector<16x128xf32> to vector<16x32xf32>
    %cst_13 = arith.constant dense<0.000000e+00> : vector<16x16xf32>
    %23 = tpu.matmul %20, %21, %cst_13 {dimension_numbers = #tpu.dot_dimension_numbers<[1], [1], [0], [0], [0, 0, 1, 0], [], []>} : vector<16x32xf32>, vector<16x32xf32>, vector<16x16xf32> -> vector<16x16xf32>
    %24 = arith.addf %23, %6 : vector<16x16xf32>
    %cst_14 = arith.constant dense<0xFF800000> : vector<16xf32>
    %25 = vector.multi_reduction <maximumf>, %24, %cst_14 [1] : vector<16x16xf32> to vector<16xf32>
    %26 = vector.shape_cast %25 : vector<16xf32> to vector<16x1xf32>
    %27 = vector.broadcast %26 : vector<16x1xf32> to vector<16x16xf32>
    %28 = arith.subf %24, %27 : vector<16x16xf32>
    %29 = math.exp %28 : vector<16x16xf32>
    %cst_15 = arith.constant dense<0.000000e+00> : vector<16xf32>
    %30 = vector.multi_reduction <add>, %29, %cst_15 [1] : vector<16x16xf32> to vector<16xf32>
    %31 = vector.shape_cast %30 : vector<16xf32> to vector<16x1xf32>
    %32 = tpu.reciprocal %31 {approx = true} : vector<16x1xf32> -> vector<16x1xf32>
    %33 = vector.broadcast %32 : vector<16x1xf32> to vector<16x16xf32>
    %34 = arith.mulf %29, %33 : vector<16x16xf32>
    %cst_16 = arith.constant dense<0.000000e+00> : vector<16x32xf32>
    %35 = tpu.matmul %34, %22, %cst_16 {dimension_numbers = #tpu.dot_dimension_numbers<[1], [0], [0], [1], [0, 0, 1, 1], [], []>} : vector<16x16xf32>, vector<16x32xf32>, vector<16x32xf32> -> vector<16x32xf32>
    %36 = vector.extract_strided_slice %3 {offsets = [0, 0], sizes = [32, 128], strides = [1, 1]} : vector<128x128xf32> to vector<32x128xf32>
    %cst_17 = arith.constant dense<0.000000e+00> : vector<16x128xf32>
    %37 = tpu.matmul %35, %36, %cst_17 {dimension_numbers = #tpu.dot_dimension_numbers<[1], [0], [0], [1], [0, 0, 1, 1], [], []>} : vector<16x32xf32>, vector<32x128xf32>, vector<16x128xf32> -> vector<16x128xf32>
    %38 = arith.addf %19, %37 : vector<16x128xf32>
    %39 = vector.extract_strided_slice %15 {offsets = [0, 32], sizes = [16, 32], strides = [1, 1]} : vector<16x128xf32> to vector<16x32xf32>
    %40 = vector.extract_strided_slice %18 {offsets = [0, 32], sizes = [16, 32], strides = [1, 1]} : vector<16x128xf32> to vector<16x32xf32>
    %41 = vector.extract_strided_slice %10 {offsets = [0, 32], sizes = [16, 32], strides = [1, 1]} : vector<16x128xf32> to vector<16x32xf32>
    %cst_18 = arith.constant dense<0.000000e+00> : vector<16x16xf32>
    %42 = tpu.matmul %39, %40, %cst_18 {dimension_numbers = #tpu.dot_dimension_numbers<[1], [1], [0], [0], [0, 0, 1, 0], [], []>} : vector<16x32xf32>, vector<16x32xf32>, vector<16x16xf32> -> vector<16x16xf32>
    %43 = arith.addf %42, %6 : vector<16x16xf32>
    %cst_19 = arith.constant dense<0xFF800000> : vector<16xf32>
    %44 = vector.multi_reduction <maximumf>, %43, %cst_19 [1] : vector<16x16xf32> to vector<16xf32>
    %45 = vector.shape_cast %44 : vector<16xf32> to vector<16x1xf32>
    %46 = vector.broadcast %45 : vector<16x1xf32> to vector<16x16xf32>
    %47 = arith.subf %43, %46 : vector<16x16xf32>
    %48 = math.exp %47 : vector<16x16xf32>
    %cst_20 = arith.constant dense<0.000000e+00> : vector<16xf32>
    %49 = vector.multi_reduction <add>, %48, %cst_20 [1] : vector<16x16xf32> to vector<16xf32>
    %50 = vector.shape_cast %49 : vector<16xf32> to vector<16x1xf32>
    %51 = tpu.reciprocal %50 {approx = true} : vector<16x1xf32> -> vector<16x1xf32>
    %52 = vector.broadcast %51 : vector<16x1xf32> to vector<16x16xf32>
    %53 = arith.mulf %48, %52 : vector<16x16xf32>
    %cst_21 = arith.constant dense<0.000000e+00> : vector<16x32xf32>
    %54 = tpu.matmul %53, %41, %cst_21 {dimension_numbers = #tpu.dot_dimension_numbers<[1], [0], [0], [1], [0, 0, 1, 1], [], []>} : vector<16x16xf32>, vector<16x32xf32>, vector<16x32xf32> -> vector<16x32xf32>
    %55 = vector.extract_strided_slice %3 {offsets = [32, 0], sizes = [32, 128], strides = [1, 1]} : vector<128x128xf32> to vector<32x128xf32>
    %cst_22 = arith.constant dense<0.000000e+00> : vector<16x128xf32>
    %56 = tpu.matmul %54, %55, %cst_22 {dimension_numbers = #tpu.dot_dimension_numbers<[1], [0], [0], [1], [0, 0, 1, 1], [], []>} : vector<16x32xf32>, vector<32x128xf32>, vector<16x128xf32> -> vector<16x128xf32>
    %57 = arith.addf %38, %56 : vector<16x128xf32>
    %58 = vector.extract_strided_slice %15 {offsets = [0, 64], sizes = [16, 32], strides = [1, 1]} : vector<16x128xf32> to vector<16x32xf32>
    %59 = vector.extract_strided_slice %18 {offsets = [0, 64], sizes = [16, 32], strides = [1, 1]} : vector<16x128xf32> to vector<16x32xf32>
    %60 = vector.extract_strided_slice %10 {offsets = [0, 64], sizes = [16, 32], strides = [1, 1]} : vector<16x128xf32> to vector<16x32xf32>
    %cst_23 = arith.constant dense<0.000000e+00> : vector<16x16xf32>
    %61 = tpu.matmul %58, %59, %cst_23 {dimension_numbers = #tpu.dot_dimension_numbers<[1], [1], [0], [0], [0, 0, 1, 0], [], []>} : vector<16x32xf32>, vector<16x32xf32>, vector<16x16xf32> -> vector<16x16xf32>
    %62 = arith.addf %61, %6 : vector<16x16xf32>
    %cst_24 = arith.constant dense<0xFF800000> : vector<16xf32>
    %63 = vector.multi_reduction <maximumf>, %62, %cst_24 [1] : vector<16x16xf32> to vector<16xf32>
    %64 = vector.shape_cast %63 : vector<16xf32> to vector<16x1xf32>
    %65 = vector.broadcast %64 : vector<16x1xf32> to vector<16x16xf32>
    %66 = arith.subf %62, %65 : vector<16x16xf32>
    %67 = math.exp %66 : vector<16x16xf32>
    %cst_25 = arith.constant dense<0.000000e+00> : vector<16xf32>
    %68 = vector.multi_reduction <add>, %67, %cst_25 [1] : vector<16x16xf32> to vector<16xf32>
    %69 = vector.shape_cast %68 : vector<16xf32> to vector<16x1xf32>
    %70 = tpu.reciprocal %69 {approx = true} : vector<16x1xf32> -> vector<16x1xf32>
    %71 = vector.broadcast %70 : vector<16x1xf32> to vector<16x16xf32>
    %72 = arith.mulf %67, %71 : vector<16x16xf32>
    %cst_26 = arith.constant dense<0.000000e+00> : vector<16x32xf32>
    %73 = tpu.matmul %72, %60, %cst_26 {dimension_numbers = #tpu.dot_dimension_numbers<[1], [0], [0], [1], [0, 0, 1, 1], [], []>} : vector<16x16xf32>, vector<16x32xf32>, vector<16x32xf32> -> vector<16x32xf32>
    %74 = vector.extract_strided_slice %3 {offsets = [64, 0], sizes = [32, 128], strides = [1, 1]} : vector<128x128xf32> to vector<32x128xf32>
    %cst_27 = arith.constant dense<0.000000e+00> : vector<16x128xf32>
    %75 = tpu.matmul %73, %74, %cst_27 {dimension_numbers = #tpu.dot_dimension_numbers<[1], [0], [0], [1], [0, 0, 1, 1], [], []>} : vector<16x32xf32>, vector<32x128xf32>, vector<16x128xf32> -> vector<16x128xf32>
    %76 = arith.addf %57, %75 : vector<16x128xf32>
    %77 = vector.extract_strided_slice %15 {offsets = [0, 96], sizes = [16, 32], strides = [1, 1]} : vector<16x128xf32> to vector<16x32xf32>
    %78 = vector.extract_strided_slice %18 {offsets = [0, 96], sizes = [16, 32], strides = [1, 1]} : vector<16x128xf32> to vector<16x32xf32>
    %79 = vector.extract_strided_slice %10 {offsets = [0, 96], sizes = [16, 32], strides = [1, 1]} : vector<16x128xf32> to vector<16x32xf32>
    %cst_28 = arith.constant dense<0.000000e+00> : vector<16x16xf32>
    %80 = tpu.matmul %77, %78, %cst_28 {dimension_numbers = #tpu.dot_dimension_numbers<[1], [1], [0], [0], [0, 0, 1, 0], [], []>} : vector<16x32xf32>, vector<16x32xf32>, vector<16x16xf32> -> vector<16x16xf32>
    %81 = arith.addf %80, %6 : vector<16x16xf32>
    %cst_29 = arith.constant dense<0xFF800000> : vector<16xf32>
    %82 = vector.multi_reduction <maximumf>, %81, %cst_29 [1] : vector<16x16xf32> to vector<16xf32>
    %83 = vector.shape_cast %82 : vector<16xf32> to vector<16x1xf32>
    %84 = vector.broadcast %83 : vector<16x1xf32> to vector<16x16xf32>
    %85 = arith.subf %81, %84 : vector<16x16xf32>
    %86 = math.exp %85 : vector<16x16xf32>
    %cst_30 = arith.constant dense<0.000000e+00> : vector<16xf32>
    %87 = vector.multi_reduction <add>, %86, %cst_30 [1] : vector<16x16xf32> to vector<16xf32>
    %88 = vector.shape_cast %87 : vector<16xf32> to vector<16x1xf32>
    %89 = tpu.reciprocal %88 {approx = true} : vector<16x1xf32> -> vector<16x1xf32>
    %90 = vector.broadcast %89 : vector<16x1xf32> to vector<16x16xf32>
    %91 = arith.mulf %86, %90 : vector<16x16xf32>
    %cst_31 = arith.constant dense<0.000000e+00> : vector<16x32xf32>
    %92 = tpu.matmul %91, %79, %cst_31 {dimension_numbers = #tpu.dot_dimension_numbers<[1], [0], [0], [1], [0, 0, 1, 1], [], []>} : vector<16x16xf32>, vector<16x32xf32>, vector<16x32xf32> -> vector<16x32xf32>
    %93 = vector.extract_strided_slice %3 {offsets = [96, 0], sizes = [32, 128], strides = [1, 1]} : vector<128x128xf32> to vector<32x128xf32>
    %cst_32 = arith.constant dense<0.000000e+00> : vector<16x128xf32>
    %94 = tpu.matmul %92, %93, %cst_32 {dimension_numbers = #tpu.dot_dimension_numbers<[1], [0], [0], [1], [0, 0, 1, 1], [], []>} : vector<16x32xf32>, vector<32x128xf32>, vector<16x128xf32> -> vector<16x128xf32>
    %95 = arith.addf %76, %94 : vector<16x128xf32>
    %c0_33 = arith.constant 0 : index
    %c0_34 = arith.constant 0 : index
    %c0_35 = arith.constant 0 : index
    %96 = vector.load %arg7[%c0_33, %c0_34, %c0_35] : memref<1x16x128xf32, #tpu.memory_space<vmem>>, vector<1x16x128xf32>
    %97 = vector.shape_cast %96 : vector<1x16x128xf32> to vector<16x128xf32>
    %98 = vector.shape_cast %95 : vector<16x128xf32> to vector<1x16x128xf32>
    tpu.vector_store %arg7[%c0_33, %c0_34, %c0_35], %98 {strides = array<i32>} : memref<1x16x128xf32, #tpu.memory_space<vmem>>, vector<1x16x128xf32>,
    return
  }
  func.func @transform_0(%arg0: i32) -> (i32, i32, i32) {
    %c0_i32 = arith.constant 0 : i32
    %c0_i32_0 = arith.constant 0 : i32
    %c0_i32_1 = arith.constant 0 : i32
    return %arg0, %c0_i32, %c0_i32_0 : i32, i32, i32
  }
  func.func @transform_1(%arg0: i32) -> (i32, i32) {
    %c0_i32 = arith.constant 0 : i32
    %c0_i32_0 = arith.constant 0 : i32
    %c0_i32_1 = arith.constant 0 : i32
    return %c0_i32, %c0_i32_0 : i32, i32
  }
  func.func @transform_2(%arg0: i32) -> (i32, i32) {
    %c0_i32 = arith.constant 0 : i32
    %c0_i32_0 = arith.constant 0 : i32
    %c0_i32_1 = arith.constant 0 : i32
    return %c0_i32, %c0_i32_0 : i32, i32
  }
  func.func @transform_3(%arg0: i32) -> (i32, i32) {
    %c0_i32 = arith.constant 0 : i32
    %c0_i32_0 = arith.constant 0 : i32
    %c0_i32_1 = arith.constant 0 : i32
    return %c0_i32, %c0_i32_0 : i32, i32
  }
  func.func @transform_4(%arg0: i32) -> (i32, i32) {
    %c0_i32 = arith.constant 0 : i32
    %c0_i32_0 = arith.constant 0 : i32
    %c0_i32_1 = arith.constant 0 : i32
    return %c0_i32, %c0_i32_0 : i32, i32
  }
  func.func @transform_5(%arg0: i32) -> (i32, i32) {
    %c0_i32 = arith.constant 0 : i32
    %c0_i32_0 = arith.constant 0 : i32
    %c0_i32_1 = arith.constant 0 : i32
    return %c0_i32, %c0_i32_0 : i32, i32
  }
  func.func @transform_6(%arg0: i32) -> (i32, i32, i32) {
    %c0_i32 = arith.constant 0 : i32
    %c0_i32_0 = arith.constant 0 : i32
    %c0_i32_1 = arith.constant 0 : i32
    return %arg0, %c0_i32, %c0_i32_0 : i32, i32, i32
  }
}

</mosaic_0001>

<bundles_post_ra>
// kernel: tpu_custom_call.1
= control target key start
LH: loop header
LB: loop body
LE: loop exit
PB: predicated region body
PF: predicated region fallthrough
CT: control target
= control target key end

     0   :  { %11 = vsyncpa [#allocation3], 0  ;;  %s3196_s0 = inlined_call_operand.hbm [shape: f32[2,16,128], index: 0, kind: input, shape index: {}]   ;;  %s3197_s1 = inlined_call_operand.hbm [shape: f32[128,640], index: 1, kind: input, shape index: {}]   ;;  %s3198_s2 = inlined_call_operand.hbm [shape: f32[128,128], index: 2, kind: input, shape index: {}]   ;;  %s3199_s3 = inlined_call_operand.hbm [shape: f32[16,128], index: 3, kind: input, shape index: {}]   ;;  %s3200_s4 = inlined_call_operand.hbm [shape: f32[16,128], index: 4, kind: input, shape index: {}]   ;;  %s3201_s5 = inlined_call_operand.vmem [shape: f32[16,16], index: 5, kind: input, shape index: {}]   ;;  %s3202_s6 = inlined_call_operand.hbm [shape: f32[2,16,128], index: 6, kind: output, shape index: {}]  }
   0x1   :  { %13 = vsyncpa [#allocation3 + $0x1], 0 }
   0x2   :  { %14 = vsyncpa [#allocation6], 0 }
   0x3   :  { %15 = vsyncpa [#allocation9], 0 }
   0x4   :  { %16 = vsyncpa [#allocation4], 0 }
   0x5   :  { %18 = vsyncpa [#allocation4 + $0x1], 0  ;;  %s2789_s21 = smov 0   ;;  %s2791_s22 = smov 0  }
   0x6   :  { %s2793_s23 = smov 0   ;;  %s2795_s24 = smov 0  }
   0x7 LB: > { %s2810_s25 = sadd.s32 4294967295, %s2736_s24   ;;  %s1922_s26 = sadd.s32 4294967294, %s2736_s24   ;;  %s2736_s24 = sphi %s2795_s24, %s3230_s24   ;;  %s2732_s23 = sphi %s2793_s23, %s3229_s23   ;;  %s2728_s22 = sphi %s2791_s22, %s3228_s22   ;;  %s2724_s21 = sphi %s2789_s21, %s3227_s21  }
   0x8   : > { %p44_p0 = scmp.ne.s32.totalorder %s2728_s22, %s2724_s21  ;;  %p3203_p1 = scmp.eq.s32.totalorder %s2810_s25, 0 }
   0x9   : > { %p179_p3 = scmp.eq.s32.totalorder %s1922_s26, 1  ;;  %p1923_p5 = scmp.ge.s32.totalorder %s2736_s24, 1 }
   0xa   : > { %p2819_p4 = por %p3203_p1, %p44_p0  ;;  %p186_p7 = scmp.lt.s32.totalorder %s2736_s24, 3 }
   0xb   : > { %p2824_p6 = por %p179_p3, %p44_p0  ;;  %s2738_s30 = smov [#allocation5]  }
   0xc   : > { %s3207_s27 = scalar_select %p2819_p4, 1, 0 }
   0xd   : > { %s3208_s28 = scalar_select %p2824_p6, 1, 0 }
   0xe   : > { %p2829_p8 = pnand %p1923_p5, %p186_p7  ;;  %s198_s7 = sshll.u32 %s2738_s30, 4  ;;  %s199_s7 = int_to_ptr.vmem [resolvable:$true] %s198_s7 }
   0xf   : > { %3209 = sst [smem:[#allocation16_spill]] %s3208_s28  ;;  %s2739_s9 = smov [#allocation8]  }
  0x10   : > { %s3210_s29 = scalar_select %p2829_p8, 1, 0 }
  0x11   : > { %p2381_p9 = pneg %p2829_p8  ;;  %s224_s10 = sshll.u32 %s2739_s9, 4  ;;  %s225_s10 = int_to_ptr.vmem [resolvable:$true] %s224_s10 }
  0x12   : > { %s2520_s13 = scalar_lea.hbm %s3197_s1, 10240 }
  0x13   : > { %p2838_p11 = pnand %p2381_p9, %p3203_p1  ;;  %p2521_p12 = scmp.ne.s32.totalorder %s3197_s1, %s2520_s13 }
  0x14   : > { %p2527_p5 = scmp.lt.u32.totalorder %s2520_s13, %s3197_s1 }
  0x15   : > { %p2850_p13 = pneg %p2838_p11 }
  0x17   : > { %p2523_p0 = pnand %p2850_p13, %p2521_p12 }
  0x19   : > { %p2524_p3 = pneg %p2523_p0 }
  0x1b   : > { %p2529_p7 = pnand %p2527_p5, %p2524_p3 }
  0x1d   : > { %2532 = shalt.err (!%p2529_p7)
}
  0x1e   : > { %s2533_s19 = scalar_lea.vmem %s199_s7, 10240  ;;  %p2541_p2 = scmp.lt.s32.totalorder %s199_s7, %s199_s7 }
  0x1f   : > { %p2534_p9 = scmp.ne.s32.totalorder %s199_s7, %s2533_s19  ;;  %p2542_p6 = scmp.lt.s32.totalorder %s2533_s19, %s2533_s19 }
  0x21   : > { %p2536_p10 = pnand %p2534_p9, %p2850_p13  ;;  %p2543_p4 = por %p2542_p6, %p2541_p2 }
  0x23   : > { %p2537_p1 = pneg %p2536_p10 }
  0x25   : > { %p2544_p8 = pnand %p2543_p4, %p2537_p1 }
  0x27   : > { %2547 = shalt.err (!%p2544_p8)
}
  0x28   : > { %s2740_s20 = smov 640   ;;  %s2741_s26 = smov 40  }
  0x29   : > { %2384 = dma.hbm_to_vmem [thread:$0]  (!%p2838_p11), %s3197_s1, 10240, %s199_s7, [#allocation6], %s2740_s20, %s2740_s20, %s2741_s26  }
  0x2a   : > { %s2742_s11 = smov [#allocation7]   ;;  %s2548_s15 = scalar_lea.hbm %s3199_s3, 256 }
  0x2b   : > { %s211_s12 = sshll.u32 %s2742_s11, 4  ;;  %p2549_p1 = scmp.ne.s32.totalorder %s3199_s3, %s2548_s15  ;;  %s212_s12 = int_to_ptr.vmem [resolvable:$true] %s211_s12 }
  0x2c   : > { %p2555_p6 = scmp.lt.u32.totalorder %s2548_s15, %s3199_s3 }
  0x2d   : > { %p2551_p2 = pnand %p2549_p1, %p2850_p13 }
  0x2f   : > { %p2552_p4 = pneg %p2551_p2 }
  0x31   : > { %p2557_p8 = pnand %p2555_p6, %p2552_p4 }
  0x33   : > { %2560 = shalt.err (!%p2557_p8)
}
  0x34   : > { %s2561_s7 = scalar_lea.vmem %s225_s10, 256  ;;  %p2569_p3 = scmp.lt.s32.totalorder %s225_s10, %s225_s10 }
  0x35   : > { %p2562_p10 = scmp.ne.s32.totalorder %s225_s10, %s2561_s7  ;;  %p2570_p5 = scmp.lt.s32.totalorder %s2561_s7, %s2561_s7 }
  0x37   : > { %p2564_p12 = pnand %p2562_p10, %p2850_p13  ;;  %p2571_p7 = por %p2570_p5, %p2569_p3 }
  0x39   : > { %p2565_p0 = pneg %p2564_p12 }
  0x3b   : > { %p2572_p9 = pnand %p2571_p7, %p2565_p0 }
  0x3d   : > { %2575 = shalt.err (!%p2572_p9)
}
  0x3e   : > { %s2743_s20 = smov 128   ;;  %s2744_s26 = smov 8  }
  0x3f   : > { %2390 = dma.hbm_to_vmem [thread:$0]  (!%p2838_p11), %s3199_s3, 256, %s225_s10, [#allocation9], %s2743_s20, %s2743_s20, %s2744_s26  }
  0x40   : > { %s2576_s13 = scalar_lea.hbm %s3198_s2, 2048 }
  0x41   : > { %p2577_p1 = scmp.ne.s32.totalorder %s3198_s2, %s2576_s13  ;;  %p2583_p6 = scmp.lt.u32.totalorder %s2576_s13, %s3198_s2 }
  0x43   : > { %p2579_p2 = pnand %p2577_p1, %p2850_p13 }
  0x45   : > { %p2580_p4 = pneg %p2579_p2 }
  0x47   : > { %p2585_p8 = pnand %p2583_p6, %p2580_p4 }
  0x49   : > { %2588 = shalt.err (!%p2585_p8)
}
  0x4a   : > { %s2589_s19 = scalar_lea.vmem %s212_s12, 2048  ;;  %p2597_p3 = scmp.lt.s32.totalorder %s212_s12, %s212_s12 }
  0x4b   : > { %p2590_p10 = scmp.ne.s32.totalorder %s212_s12, %s2589_s19  ;;  %p2598_p5 = scmp.lt.s32.totalorder %s2589_s19, %s2589_s19 }
  0x4d   : > { %p2592_p12 = pnand %p2590_p10, %p2850_p13  ;;  %p2599_p7 = por %p2598_p5, %p2597_p3 }
  0x4f   : > { %p2593_p0 = pneg %p2592_p12 }
  0x51   : > { %p2600_p9 = pnand %p2599_p7, %p2593_p0 }
  0x53   : > { %2603 = shalt.err (!%p2600_p9)
}
  0x54   : > { %2387 = dma.hbm_to_vmem [thread:$0]  (!%p2838_p11), %s3198_s2, 2048, %s212_s12, [#allocation6], %s2743_s20, %s2743_s20, %s2744_s26  }
  0x55   : > { %s2745_s28 = smov [#allocation10]   ;;  %s2604_s13 = scalar_lea.hbm %s3200_s4, 256 }
  0x56   : > { %s237_s30 = sshll.u32 %s2745_s28, 4  ;;  %p2605_p1 = scmp.ne.s32.totalorder %s3200_s4, %s2604_s13  ;;  %s238_s30 = int_to_ptr.vmem [resolvable:$true] %s237_s30 }
  0x57   : > { %p2611_p6 = scmp.lt.u32.totalorder %s2604_s13, %s3200_s4 }
  0x58   : > { %p2607_p2 = pnand %p2605_p1, %p2850_p13 }
  0x5a   : > { %p2608_p4 = pneg %p2607_p2 }
  0x5c   : > { %p2613_p8 = pnand %p2611_p6, %p2608_p4 }
  0x5e   : > { %2616 = shalt.err (!%p2613_p8)
}
  0x5f   : > { %s2617_s12 = scalar_lea.vmem %s238_s30, 256  ;;  %p2625_p3 = scmp.lt.s32.totalorder %s238_s30, %s238_s30 }
  0x60   : > { %p2618_p10 = scmp.ne.s32.totalorder %s238_s30, %s2617_s12  ;;  %p2626_p5 = scmp.lt.s32.totalorder %s2617_s12, %s2617_s12 }
  0x62   : > { %p2620_p12 = pnand %p2618_p10, %p2850_p13  ;;  %p2627_p7 = por %p2626_p5, %p2625_p3 }
  0x64   : > { %p2621_p0 = pneg %p2620_p12 }
  0x66   : > { %p2628_p9 = pnand %p2627_p7, %p2621_p0 }
  0x68   : > { %2631 = shalt.err (!%p2628_p9)
}
  0x69   : > { %2393 = dma.hbm_to_vmem [thread:$0]  (!%p2838_p11), %s3200_s4, 256, %s238_s30, [#allocation9], %s2743_s20, %s2743_s20, %s2744_s26  }
  0x6a   : > { %s2930_s16 = sadd.s32 1, %s2736_s24   ;;  %s31_s8 = sadd.s32 1, %s2732_s23 }
  0x6b   : > { %s28_s7 = ssub.s32 %s2736_s24, %s2930_s16  ;;  %p38_p13 = scmp.ne.s32.totalorder %s2732_s23, %s2728_s22 }
  0x6c   : > { %p29_p1 = scmp.eq.s32.totalorder %s28_s7, 0  ;;  %p39_p2 = scmp.eq.s32.totalorder %s2736_s24, 0 }
  0x6d   : > { %p3213_p4 = scmp.eq.s32.totalorder %s2810_s25, 1  ;;  %p2406_p8 = scmp.lt.s32.totalorder %s2736_s24, 2 }
  0x6e   : > { %s2946_s9 = scalar_select %p29_p1, %s2732_s23, %s31_s8  }
  0x6f   : > { %p2940_p6 = por %p3213_p4, %p38_p13  ;;  %p40_p10 = por %p39_p2, %p38_p13 }
  0x70   : > { %s254_s11 = sand.u32 1, %s2732_s23   ;;  %s1976_s30 = sshll.u32 %s2736_s24, 8 }
  0x71   : > { %s1929_s13 = sshll.u32 %s254_s11, 4  ;;  %s2953_s17 = scalar_lea.hbm %s3196_s0, %s1976_s30 }
  0x72   : > { %s258_s18 = scalar_lea.vmem [#allocation2], %s1929_s13  ;;  %p2957_p11 = pnand %p2406_p8, %p40_p10 }
  0x73   : > { %s265_s12 = sshll.u32 %s258_s18, 4  ;;  %s2961_s10 = scalar_lea.sflag [#allocation3], %s254_s11  ;;  %s2955_s12 = int_to_ptr.vmem [resolvable:$true] %s265_s12 }
  0x74   : > { %s2632_s8 = scalar_lea.hbm %s2953_s17, 256  ;;  %p2634_p0 = pneg %p2957_p11 }
  0x75   : > { %p2633_p12 = scmp.ne.s32.totalorder %s2953_s17, %s2632_s8  ;;  %s2637_s30 = scalar_lea.hbm %s3196_s0, 512 }
  0x76   : > { %p2638_p7 = scmp.lt.u32.totalorder %s2953_s17, %s3196_s0  ;;  %p2639_p9 = scmp.lt.u32.totalorder %s2637_s30, %s2632_s8 }
  0x77   : > { %p2635_p3 = pnand %p2634_p0, %p2633_p12  ;;  %p2641_p1 = scmp.lt.u32.totalorder %s2632_s8, %s2953_s17 }
  0x78   : > { %p2640_p13 = por %p2639_p9, %p2638_p7 }
  0x79   : > { %p2636_p5 = pneg %p2635_p3 }
  0x7a   : > { %p2642_p2 = por %p2641_p1, %p2640_p13 }
  0x7c   : > { %p2643_p4 = pnand %p2642_p2, %p2636_p5 }
  0x7e   : > { %2646 = shalt.err (!%p2643_p4)
}
  0x7f   : > { %s2647_s11 = scalar_lea.vmem %s2955_s12, 256  ;;  %s2746_s18 = smov [#allocation2]  }
  0x80   : > { %p2648_p8 = scmp.ne.s32.totalorder %s2955_s12, %s2647_s11  ;;  %s2652_s7 = sshll.u32 %s2746_s18, 4  ;;  %s2653_s7 = int_to_ptr.vmem [resolvable:$false] %s2652_s7 }
  0x81   : > { %s2654_s13 = scalar_lea.vmem %s2653_s7, 512  ;;  %p2655_p3 = scmp.lt.s32.totalorder %s2955_s12, %s2653_s7 }
  0x82   : > { %p2650_p10 = pnand %p2648_p8, %p2634_p0  ;;  %p2656_p7 = scmp.lt.s32.totalorder %s2654_s13, %s2647_s11 }
  0x84   : > { %p2651_p12 = pneg %p2650_p10  ;;  %p2657_p9 = por %p2656_p7, %p2655_p3 }
  0x86   : > { %p2658_p13 = pnand %p2657_p9, %p2651_p12 }
  0x88   : > { %2661 = shalt.err (!%p2658_p13)
}
  0x89   : > { %2397 = dma.hbm_to_vmem [thread:$0]  (!%p2957_p11), %s2953_s17, 256, %s2955_s12, %s2961_s10, %s2743_s20, %s2743_s20, %s2744_s26  }
  0x8a   : > { %p3216_p0 = scmp.ne.s32.totalorder %s3210_s29, 0 }
  0x8b   : > { %s2995_s8 = sand.u32 (!%p3216_p0), 1, %s2728_s22   ;;  %p3217_p5 = scmp.ne.s32.totalorder (!%p3216_p0), %s3207_s27, 0 }
  0x8c   : > { %277 = sbr.rel (%p3216_p0) target bundleno = 2520 (0x9d8), region = 44  ;;  %s1933_s30 = sshll.u32 (!%p3216_p0), %s2995_s8, 4 }
  0x8d   : > { %s280_s14 = scalar_lea.sflag (!%p3216_p0), [#allocation3], %s2995_s8  ;;  %s3001_s19 = scalar_lea.vmem (!%p3216_p0), [#allocation2], %s1933_s30 }
  0x93   : > { %2707 = dma.done.wait (%p3217_p5), %s280_s14, 256  }
  0x94   : > { %2709 = vsyncadd (%p3217_p5), %s280_s14, 4294967040  ;;  %p3218_p11 = scmp.eq.s32.totalorder %s2810_s25, 0 }
  0x96   : > { %2711 = dma.done.wait (%p3218_p11), [#allocation6], 12288   ;;  %p3219_p1 = pmov %p3218_p11 }
  0x98   : > { %2713 = vsyncadd (%p3219_p1), [#allocation6], 4294955008  ;;  %p3220_p2 = pmov %p3219_p1 }
  0x99   : > { %p3221_p4 = pmov %p3219_p1 }
  0x9a   : > { %2715 = dma.done.wait (%p3220_p2), [#allocation9], 512  }
  0x9b   : > { %2717 = vsyncadd (%p3221_p4), [#allocation9], 4294966784  ;;  %v2747_v0 = vmov 0.0   ;;  %v331_v1 = vld [vmem:[#allocation5 + $0x8] sm:$0xff]  ;;  %v336_v2 = vld [vmem:[#allocation5 + $0x30] sm:$0xff]  ;;  %vm673_vm0 = vcmask 261120  }
  0x9c   : > { %496 = vmatprep.mubr.f32.mxu0 %v2747_v0  ;;  %573 = vmatprep.mubr.f32.mxu1 %v2747_v0  ;;  %v333_v3 = vld [vmem:[#allocation5 + $0x18] sm:$0xff]  ;;  %v2187_v4 = vpack.c.bf16 %v336_v2, %v331_v1  ;;  %v338_v5 = vld [vmem:[#allocation5 + $0x40] sm:$0xff]  ;;  %v335_v7 = vld [vmem:[#allocation5 + $0x28] sm:$0xff]  ;;  %s2748_s27 = smov 64   ;;  %vm761_vm2 = vcmask 130048   ;;  %s2749_s12 = smov 96  }
  0x9d   : > { %v330_v6 = vld [vmem:[#allocation5] sm:$0xff]  ;;  %v2219_v8 = vpack.c.bf16 %v338_v5, %v333_v3  ;;  %v332_v10 = vld [vmem:[#allocation5 + $0x10] sm:$0xff]  ;;  %v337_v11 = vld [vmem:[#allocation5 + $0x38] sm:$0xff]  ;;  %s2750_s10 = smov 32   ;;  %s327_s15 = scalar_lea.vmem [#allocation11], %s1933_s30 }
  0x9e   : > { %v2189_v9 = vpack.c.bf16 %v335_v7, %v330_v6  ;;  %v341_v12 = vld [vmem:[#allocation5 + $0x58] sm:$0xff]  ;;  %2188 = vmatprep.subr.bf16.mxu0 %v2187_v4  ;;  %v2221_v13 = vpack.c.bf16 %v337_v11, %v332_v10  ;;  %v346_v14 = vld [vmem:[#allocation5 + $0x80] sm:$0xff]  ;;  %v343_v15 = vld [vmem:[#allocation5 + $0x68] sm:$0xff]  ;;  %s1811_s11 = sshll.u32 %s327_s15, 4  ;;  %s1977_s18 = sshll.u32 %s2810_s25, 8  ;;  %s3147_s11 = int_to_ptr.vmem [resolvable:$true] %s1811_s11 }
  0x9f   : > { %v348_v16 = vld [vmem:[#allocation5 + $0x90] sm:$0xff]  ;;  %2220 = vmatprep.subr.bf16.mxu1 %v2219_v8  ;;  %v2191_v17 = vpack.c.bf16 %v346_v14, %v341_v12  ;;  %v345_v20 = vld [vmem:[#allocation5 + $0x78] sm:$0xff]  ;;  %v342_v21 = vld [vmem:[#allocation5 + $0x60] sm:$0xff]  ;;  %s3152_s14 = scalar_lea.hbm %s3202_s6, %s1977_s18  ;;  %s2751_s25 = smov [#allocation11]  }
  0xa0   : > { %2190 = vmatpush1.bf16.msra.mxu0 %v2189_v9  ;;  %v2223_v18 = vpack.c.bf16 %v348_v16, %v343_v15  ;;  %v340_v19 = vld [vmem:[#allocation5 + $0x50] sm:$0xff]  ;;  %2222 = vmatpush1.bf16.msra.mxu1 %v2221_v13  ;;  %v347_v23 = vld [vmem:[#allocation5 + $0x88] sm:$0xff]  ;;  %v353_v28 = vld [vmem:[#allocation5 + $0xb8] sm:$0xff]  ;;  %s2666_s30 = sshll.u32 %s2751_s25, 4  ;;  %s2667_s30 = int_to_ptr.vmem [resolvable:$false] %s2666_s30 }
  0xa1   : > { %v2193_v22 = vpack.c.bf16 %v345_v20, %v340_v19  ;;  %v351_v24 = vld [vmem:[#allocation5 + $0xa8] sm:$0xff]  ;;  %v356_v25 = vld [vmem:[#allocation5 + $0xd0] sm:$0xff]  ;;  %2192 = vmatprep.subr.bf16.mxu0 %v2191_v17  ;;  %v2225_v26 = vpack.c.bf16 %v347_v23, %v342_v21  ;;  %v358_v29 = vld [vmem:[#allocation5 + $0xe0] sm:$0xff]  ;;  %s2668_s29 = scalar_lea.vmem %s2667_s30, 512  ;;  %p2669_p3 = scmp.lt.s32.totalorder %s3147_s11, %s2667_s30 }
  0xa2   : > { %2224 = vmatprep.subr.bf16.mxu1 %v2223_v18  ;;  %v2195_v27 = vpack.c.bf16 %v356_v25, %v351_v24  ;;  %v350_v30 = vld [vmem:[#allocation5 + $0xa0] sm:$0xff]  ;;  %v2227_v31 = vpack.c.bf16 %v358_v29, %v353_v28  ;;  %v355_v32 = vld [vmem:[#allocation5 + $0xc8] sm:$0xff]  ;;  %v352_v33 = vld [vmem:[#allocation5 + $0xb0] sm:$0xff] }
  0xa3   : > { %v357_v34 = vld [vmem:[#allocation5 + $0xd8] sm:$0xff]  ;;  %v2197_v35 = vpack.c.bf16 %v355_v32, %v350_v30  ;;  %v366_v37 = vld [vmem:[#allocation5 + $0x120] sm:$0xff]  ;;  %v363_v38 = vld [vmem:[#allocation5 + $0x108] sm:$0xff] }
  0xa4   : > { %2194 = vmatpush1.bf16.msra.mxu0 %v2193_v22  ;;  %v361_v36 = vld [vmem:[#allocation5 + $0xf8] sm:$0xff]  ;;  %2226 = vmatpush1.bf16.msra.mxu1 %v2225_v26  ;;  %v2229_v39 = vpack.c.bf16 %v357_v34, %v352_v33  ;;  %v368_v41 = vld [vmem:[#allocation5 + $0x130] sm:$0xff]  ;;  %v362_v45 = vld [vmem:[#allocation5 + $0x100] sm:$0xff] }
  0xa5   : > { %2196 = vmatprep.subr.bf16.mxu0 %v2195_v27  ;;  %v2199_v40 = vpack.c.bf16 %v366_v37, %v361_v36  ;;  %v360_v42 = vld [vmem:[#allocation5 + $0xf0] sm:$0xff]  ;;  %v365_v43 = vld [vmem:[#allocation5 + $0x118] sm:$0xff]  ;;  %2228 = vmatprep.subr.bf16.mxu1 %v2227_v31  ;;  %v2231_v44 = vpack.c.bf16 %v368_v41, %v363_v38  ;;  %v367_v46 = vld [vmem:[#allocation5 + $0x128] sm:$0xff] }
  0xa6   : > { %v371_v47 = vld [vmem:[#allocation5 + $0x148] sm:$0xff]  ;;  %v376_v48 = vld [vmem:[#allocation5 + $0x170] sm:$0xff]  ;;  %v373_v49 = vld [vmem:[#allocation5 + $0x158] sm:$0xff]  ;;  %v2201_v51 = vpack.c.bf16 %v365_v43, %v360_v42  ;;  %v2233_v52 = vpack.c.bf16 %v367_v46, %v362_v45 }
  0xa7   : > { %v378_v50 = vld [vmem:[#allocation5 + $0x180] sm:$0xff]  ;;  %v2203_v53 = vpack.c.bf16 %v376_v48, %v371_v47  ;;  %v375_v55 = vld [vmem:[#allocation5 + $0x168] sm:$0xff]  ;;  %v372_v56 = vld [vmem:[#allocation5 + $0x150] sm:$0xff] }
  0xa8   : > { %2198 = vmatpush1.bf16.msra.mxu0 %v2197_v35  ;;  %2230 = vmatpush1.bf16.msra.mxu1 %v2229_v39  ;;  %v370_v54 = vld [vmem:[#allocation5 + $0x140] sm:$0xff]  ;;  %v2235_v57 = vpack.c.bf16 %v378_v50, %v373_v49  ;;  %v377_v58 = vld [vmem:[#allocation5 + $0x178] sm:$0xff]  ;;  %v383_v61 = vld [vmem:[#allocation5 + $0x1a8] sm:$0xff] }
  0xa9   : > { %2200 = vmatprep.subr.bf16.mxu0 %v2199_v40  ;;  %2232 = vmatprep.subr.bf16.mxu1 %v2231_v44  ;;  %v381_v59 = vld [vmem:[#allocation5 + $0x198] sm:$0xff]  ;;  %v386_v60 = vld [vmem:[#allocation5 + $0x1c0] sm:$0xff]  ;;  %v388_v62 = vld [vmem:[#allocation5 + $0x1d0] sm:$0xff]  ;;  %v2205_v63 = vpack.c.bf16 %v375_v55, %v370_v54  ;;  %v2237_v1 = vpack.c.bf16 %v377_v58, %v372_v56 }
  0xaa   : > { %v2207_v2 = vpack.c.bf16 %v386_v60, %v381_v59  ;;  %v380_v3 = vld [vmem:[#allocation5 + $0x190] sm:$0xff]  ;;  %v385_v4 = vld [vmem:[#allocation5 + $0x1b8] sm:$0xff]  ;;  %v382_v5 = vld [vmem:[#allocation5 + $0x1a0] sm:$0xff]  ;;  %v2239_v6 = vpack.c.bf16 %v388_v62, %v383_v61 }
  0xab   : > { %v387_v7 = vld [vmem:[#allocation5 + $0x1c8] sm:$0xff]  ;;  %v396_v9 = vld [vmem:[#allocation5 + $0x210] sm:$0xff]  ;;  %v393_v10 = vld [vmem:[#allocation5 + $0x1f8] sm:$0xff]  ;;  %v2209_v12 = vpack.c.bf16 %v385_v4, %v380_v3 }
  0xac   : > { %2202 = vmatpush1.bf16.msra.mxu0 %v2201_v51  ;;  %2234 = vmatpush1.bf16.msra.mxu1 %v2233_v52  ;;  %v391_v8 = vld [vmem:[#allocation5 + $0x1e8] sm:$0xff]  ;;  %v398_v11 = vld [vmem:[#allocation5 + $0x220] sm:$0xff]  ;;  %v2241_v13 = vpack.c.bf16 %v387_v7, %v382_v5  ;;  %v392_v17 = vld [vmem:[#allocation5 + $0x1f0] sm:$0xff] }
  0xad   : > { %2204 = vmatprep.subr.bf16.mxu0 %v2203_v53  ;;  %2236 = vmatprep.subr.bf16.mxu1 %v2235_v57  ;;  %v2211_v14 = vpack.c.bf16 %v396_v9, %v391_v8  ;;  %v390_v15 = vld [vmem:[#allocation5 + $0x1e0] sm:$0xff]  ;;  %v395_v16 = vld [vmem:[#allocation5 + $0x208] sm:$0xff]  ;;  %v2243_v18 = vpack.c.bf16 %v398_v11, %v393_v10  ;;  %v397_v19 = vld [vmem:[#allocation5 + $0x218] sm:$0xff] }
  0xae   : > { %v401_v20 = vld [vmem:[#allocation5 + $0x238] sm:$0xff]  ;;  %v406_v21 = vld [vmem:[#allocation5 + $0x260] sm:$0xff]  ;;  %v403_v22 = vld [vmem:[#allocation5 + $0x248] sm:$0xff]  ;;  %v2213_v24 = vpack.c.bf16 %v395_v16, %v390_v15  ;;  %v2245_v25 = vpack.c.bf16 %v397_v19, %v392_v17 }
  0xaf   : > { %v408_v23 = vld [vmem:[#allocation5 + $0x270] sm:$0xff]  ;;  %v2215_v26 = vpack.c.bf16 %v406_v21, %v401_v20  ;;  %v405_v28 = vld [vmem:[#allocation5 + $0x258] sm:$0xff]  ;;  %v402_v29 = vld [vmem:[#allocation5 + $0x240] sm:$0xff] }
  0xb0   : > { %2206 = vmatpush1.bf16.msra.mxu0 %v2205_v63  ;;  %2238 = vmatpush1.bf16.msra.mxu1 %v2237_v1  ;;  %v400_v27 = vld [vmem:[#allocation5 + $0x230] sm:$0xff]  ;;  %v2247_v30 = vpack.c.bf16 %v408_v23, %v403_v22  ;;  %v407_v31 = vld [vmem:[#allocation5 + $0x268] sm:$0xff]  ;;  %v334_v32 = vld [vmem:[#allocation5 + $0x20] sm:$0xff] }
  0xb1   : > { %2208 = vmatprep.subr.bf16.mxu0 %v2207_v2  ;;  %2240 = vmatprep.subr.bf16.mxu1 %v2239_v6  ;;  %v339_v33 = vld [vmem:[#allocation5 + $0x48] sm:$0xff]  ;;  %v2217_v34 = vpack.c.bf16 %v405_v28, %v400_v27  ;;  %v2249_v35 = vpack.c.bf16 %v407_v31, %v402_v29  ;;  %v344_v37 = vld [vmem:[#allocation5 + $0x70] sm:$0xff]  ;;  %v349_v38 = vld [vmem:[#allocation5 + $0x98] sm:$0xff] }
  0xb2   : > { %v2251_v36 = vpack.c.bf16 %v339_v33, %v334_v32  ;;  %v328_v39 = vld [vmem:[%s3001_s19] sm:$0xff]  ;;  %v2255_v40 = vpack.c.bf16 %v349_v38, %v344_v37  ;;  %v359_v42 = vld [vmem:[#allocation5 + $0xe8] sm:$0xff]  ;;  %v369_v46 = vld [vmem:[#allocation5 + $0x138] sm:$0xff] }
  0xb3   : > { %v354_v41 = vld [vmem:[#allocation5 + $0xc0] sm:$0xff]  ;;  %v329_v43 = vld [vmem:[%s3001_s19 + $0x8] sm:$0xff]  ;;  %v364_v45 = vld [vmem:[#allocation5 + $0x110] sm:$0xff]  ;;  %s1798_s19 = scalar_lea.sflag [#allocation4], %s2995_s8 }
  0xb4   : > { %2210 = vmatpush1.bf16.msra.mxu0 %v2209_v12  ;;  %2242 = vmatpush1.bf16.msra.mxu1 %v2241_v13  ;;  %v2259_v44 = vpack.c.bf16 %v359_v42, %v354_v41  ;;  %v2263_v47 = vpack.c.bf16 %v369_v46, %v364_v45  ;;  %v374_v48 = vld [vmem:[#allocation5 + $0x160] sm:$0xff]  ;;  %v379_v49 = vld [vmem:[#allocation5 + $0x188] sm:$0xff]  ;;  %v384_v51 = vld [vmem:[#allocation5 + $0x1b0] sm:$0xff] }
  0xb5   : > { %2212 = vmatprep.subr.bf16.mxu0 %v2211_v14  ;;  %2244 = vmatprep.subr.bf16.mxu1 %v2243_v18  ;;  %v2267_v50 = vpack.c.bf16 %v379_v49, %v374_v48  ;;  %v389_v52 = vld [vmem:[#allocation5 + $0x1d8] sm:$0xff]  ;;  %v394_v54 = vld [vmem:[#allocation5 + $0x200] sm:$0xff]  ;;  %v399_v55 = vld [vmem:[#allocation5 + $0x228] sm:$0xff] }
  0xb6   : > { %v2271_v53 = vpack.c.bf16 %v389_v52, %v384_v51  ;;  %v404_v56 = vld [vmem:[#allocation5 + $0x250] sm:$0xff]  ;;  %v409_v57 = vld [vmem:[#allocation5 + $0x278] sm:$0xff]  ;;  %v426_v59 = vld [vmem:[#allocation8] sm:$0xff] }
  0xb7   : > { %v2279_v58 = vpack.c.bf16 %v409_v57, %v404_v56  ;;  %v428_v61 = vld [vmem:[#allocation10] sm:$0xff]  ;;  %v427_v3 = vld [vmem:[#allocation8 + $0x8] sm:$0xff]  ;;  %v429_v6 = vld [vmem:[#allocation10 + $0x8] sm:$0xff] }
  0xb8   : > { %2214 = vmatpush1.bf16.msra.mxu0 %v2213_v24  ;;  %2246 = vmatpush1.bf16.msra.mxu1 %v2245_v25  ;;  %vm3033_vm1 = vmpackc.low %vm673_vm0, %vm673_vm0  ;;  %v3048_v27 = vld [vmem:[%s3201_s5] sm:$0xff]  ;;  %v3053_v29 = vld [vmem:[%s3201_s5 + $0x8] sm:$0xff] }
  0xb9   : > { %2216 = vmatprep.subr.bf16.mxu0 %v2215_v26  ;;  %2248 = vmatprep.subr.bf16.mxu1 %v2247_v30 }
  0xbc   : > { %2218 = vmatpush1.bf16.msra.mxu0 %v2217_v34  ;;  %2250 = vmatpush1.bf16.msra.mxu1 %v2249_v35 }
  0xbd   : > { %2252 = vmatprep.subr.bf16.mxu0 %v2251_v36 }
  0xbf   : > { %497 = vmatmul.mubr.f32.vlgmr.msra.gmra.mrb[0].mxu0 %v328_v39  ;;  %574 = vmatmul.mubr.f32.vlgmr.msra.gmra.mrb[0].mxu1 %v328_v39 }
  0xc0   : > { %2254 = vmatpush3.bf16.msra.mxu0 %v2251_v36  ;;  %502 = vmatprep.mubr.f32.mxu0 %v2747_v0 }
  0xc1   : > { %2256 = vmatprep.subr.bf16.mxu0 %v2255_v40  ;;  %579 = vmatprep.mubr.f32.mxu1 %v2747_v0  ;;  %v2275_v0 = vpack.c.bf16 %v399_v55, %v394_v54 }
  0xc3   : > { %503 = vmatmul.mubr.f32.gmra.mrb[2].mxu0 %v329_v43  ;;  %580 = vmatmul.mubr.f32.gmra.mrb[2].mxu1 %v329_v43 }
  0xc4   : > { %2258 = vmatpush3.bf16.msra.mxu0 %v2255_v40  ;;  %2084 = vmatprep.mubr.f32.mxu0 %v328_v39 }
  0xc5   : > { %2260 = vmatprep.subr.bf16.mxu0 %v2259_v44 }
  0xc8   : > { %2262 = vmatpush3.bf16.msra.mxu0 %v2259_v44 }
  0xc9   : > { %2264 = vmatprep.subr.bf16.mxu0 %v2263_v47 }
  0xcc   : > { %2266 = vmatpush3.bf16.msra.mxu0 %v2263_v47 }
  0xcd   : > { %2268 = vmatprep.subr.bf16.mxu0 %v2267_v50 }
  0xd0   : > { %2270 = vmatpush3.bf16.msra.mxu0 %v2267_v50 }
  0xd1   : > { %2272 = vmatprep.subr.bf16.mxu0 %v2271_v53 }
  0xd4   : > { %2274 = vmatpush3.bf16.msra.mxu0 %v2271_v53 }
  0xd5   : > { %2276 = vmatprep.subr.bf16.mxu0 %v2275_v0 }
  0xd8   : > { %2278 = vmatpush3.bf16.msra.mxu0 %v2275_v0 }
  0xd9   : > { %2280 = vmatprep.subr.bf16.mxu0 %v2279_v58 }
  0xdc   : > { %2282 = vmatpush3.bf16.msra.mxu0 %v2279_v58 }
  0xdf   : > { %2085 = vmatmul.mubr.f32.vlgmr.msra.gmra.mrb[4].mxu0 %v329_v43 }
 0x192   : > { %v498_v60 = vpop.f32.mrb[0].mxu0  ;;  %v575_v63 = vpop.f32.mrb[0].mxu1 }
 0x193   : > { %v661_v62 = vmul.f32 %v498_v60, %v426_v59  ;;  %v500_v1 = vpop.f32.mrb[1].mxu0  ;;  %v577_v2 = vpop.f32.mrb[1].mxu1 }
 0x194   : > { %v663_v4 = vmul.f32 %v577_v2, %v428_v61  ;;  %v667_v20 = vmul.f32 %v500_v1, %v426_v59 }
 0x196   : > { %v504_v5 = vpop.f32.mrb[2].mxu0  ;;  %v3021_v7 = vadd.f32 %v663_v4, %v661_v62  ;;  %v581_v9 = vpop.f32.mrb[2].mxu1 }
 0x197   : > { %v662_v8 = vmul.f32 %v504_v5, %v427_v3  ;;  %v506_v10 = vpop.f32.mrb[3].mxu0  ;;  %v583_v11 = vpop.f32.mrb[3].mxu1  ;;  %v2289_v12 = vpack.c.bf16 %v581_v9, %v575_v63  ;;  %v3023_v13 = vpack.i.bf16 %v581_v9, %v575_v63 }
 0x198   : > { %1229 = vrot.lane.b32.xlu1 %v3021_v7, %s2748_s27  ;;  %2091 = vmatprep.mubr.msk.f32.mxu1 %vm673_vm0, %v3021_v7  ;;  %v664_v14 = vmul.f32 %v583_v11, %v429_v6  ;;  %v668_v17 = vmul.f32 %v506_v10, %v427_v3 }
 0x199   : > { %2290 = vmatprep.subr.bf16.mxu0 %v2289_v12 }
 0x19a   : > { %v3029_v15 = vadd.f32 %v664_v14, %v662_v8  ;;  %2292 = vmatpush3.bf16.msra.mxu0 %v2289_v12 }
 0x1b2   : > { %v2086_v16 = vpop.f32.mrb[4].mxu0 }
 0x1b3   : > { %v670_v18 = vmul.f32 %v2086_v16, %v429_v6  ;;  %v652_v19 = vpop.f32.mrb[5].mxu0 }
 0x1b4   : > { %v669_v21 = vmul.f32 %v652_v19, %v428_v61 }
 0x1b5   : > { %v672_v22 = vadd.f32 %v670_v18, %v668_v17 }
 0x1b6   : > { %v671_v23 = vadd.f32 %v669_v21, %v667_v20 }
 0x1b8   : > { %v2283_v25 = vpack.c.bf16 %v672_v22, %v671_v23  ;;  %v3037_v26 = vpack.i.bf16 %v672_v22, %v671_v23 }
 0x1ba   : > { %2285 = vmatprep.subr.msk.bf16.mxu1 %vm3033_vm1, %v2283_v25 }
 0x1bb   : > { %2288 = vmatpush3.bf16.xpose.msk.msra.mxu1 %vm3033_vm1, %v2283_v25 }
 0x1c2   : > { %2092 = vmatmul.mubr.msk.f32.vlgmr.msra.gmra.mrb[4].mxu1 %vm673_vm0, %v3029_v15 }
 0x20a   : > { %v1230_v50 = vpop.permute.xlu1 %1229 }
 0x295   : > { %v2093_v28 = vpop.f32.mrb[4].mxu1 }
 0x296   : > { %v752_v30 = vpop.f32.mrb[5].mxu1  ;;  %v758_v32 = vadd.f32 %v2093_v28, %v3053_v29 }
 0x297   : > { %v753_v31 = vadd.f32 %v752_v30, %v3048_v27 }
 0x298   : > { %v765_v34 = vsel %vm761_vm2, %v758_v32, -inf }
 0x299   : > { %v762_v33 = vsel %vm761_vm2, %v753_v31, -inf }
 0x29a   : > { %763 = vmax.xlane.f32.xlu0 %v762_v33 }
 0x29e   : > { %766 = vmax.xlane.f32.xlu0 %v765_v34 }
 0x2b4   : > { %2459 = vrot.lane.b32.xlu0 %v3037_v26, %s2748_s27 }
 0x2b8   : > { %865 = vrot.lane.b32.xlu0 %v3021_v7, %s2749_s12 }
 0x327   : > { %v764_v35 = vpop.xlane.xlu0 %763 }
 0x328   : > { %v768_v36 = vsub.f32 %v753_v31, %v764_v35 }
 0x32a   : > { %v770_v39 = vmul.f32 1.442695, %v768_v36 }
 0x32b   : > { %v767_v37 = vpop.xlane.xlu0 %766 }
 0x32c   : > { %v769_v38 = vsub.f32 %v758_v32, %v767_v37 }
 0x32e   : > { %v772_v40 = vmul.f32 1.442695, %v769_v38 }
 0x32f   : > { %v2460_v41 = vpop.permute.xlu0 %2459 }
 0x330   : > { %2488 = vpow2.f32 %v772_v40  ;;  %v2462_v42 = vunpack.i.h.bf16 %v2460_v41  ;;  %v2461_v43 = vunpack.i.l.bf16 %v2460_v41 }
 0x331   : > { %2490 = vpow2.f32 %v770_v39 }
 0x332   : > { %v2319_v44 = vpack.c.bf16 %v2462_v42, %v2461_v43 }
 0x333   : > { %v866_v45 = vpop.permute.xlu0 %865 }
 0x334   : > { %2105 = vmatprep.mubr.msk.f32.mxu1 %vm673_vm0, %v866_v45  ;;  %2321 = vmatprep.subr.msk.bf16.mxu0 %vm3033_vm1, %v2319_v44 }
 0x33a   : > { %v2489_v46 = vpop.eup %2488 }
 0x33b   : > { %v777_v47 = vsel %vm761_vm2, %v2489_v46, 0.0  ;;  %v2491_v48 = vpop.eup %2490 }
 0x33c   : > { %778 = vadd.xlane.f32.xlu1 %v777_v47  ;;  %v774_v49 = vsel %vm761_vm2, %v2491_v48, 0.0 }
 0x340   : > { %775 = vadd.xlane.f32.xlu1 %v774_v49 }
 0x351   : > { %1231 = vrot.lane.b32.xlu1 %v3029_v15, %s2748_s27 }
 0x355   : > { %2464 = vrot.lane.b32.xlu1 %v3037_v26, %s2749_s12 }
 0x359   : > { %867 = vrot.lane.b32.xlu1 %v3029_v15, %s2749_s12 }
 0x3c9   : > { %v779_v51 = vpop.xlane.xlu1 %778 }
 0x3ca   : > { %2492 = vrcp.f32 %v779_v51 }
 0x3cd   : > { %v776_v52 = vpop.xlane.xlu1 %775 }
 0x3ce   : > { %2494 = vrcp.f32 %v776_v52 }
 0x3d1   : > { %v1232_v53 = vpop.permute.xlu1 %1231 }
 0x3d4   : > { %v2493_v56 = vpop.eup %2492 }
 0x3d5   : > { %v2465_v54 = vpop.permute.xlu1 %2464  ;;  %v783_v60 = vmul.f32 %v2493_v56, %v2489_v46 }
 0x3d6   : > { %v2467_v55 = vunpack.i.h.bf16 %v2465_v54  ;;  %v2466_v0 = vunpack.i.l.bf16 %v2465_v54 }
 0x3d8   : > { %v2495_v57 = vpop.eup %2494  ;;  %v2293_v58 = vpack.c.bf16 %v2467_v55, %v2466_v0 }
 0x3d9   : > { %v782_v59 = vmul.f32 %v2495_v57, %v2491_v48  ;;  %v868_v61 = vpop.permute.xlu1 %867 }
 0x3da   : > { %2295 = vmatprep.subr.msk.bf16.mxu1 %vm3033_vm1, %v2293_v58 }
 0x3db   : > { %2098 = vmatprep.mubr.msk.f32.mxu0 %vm761_vm2, %v782_v59  ;;  %2298 = vmatpush3.bf16.xpose.msk.msra.mxu1 %vm3033_vm1, %v2293_v58 }
 0x3dc   : > { %2099 = vmatmul.mubr.msk.f32.vlgmr.msra.gmra.mrb[6].mxu0 %vm761_vm2, %v783_v60 }
 0x3dd   : > { %2324 = vmatpush3.bf16.xpose.msk.msra.mxu0 %vm3033_vm1, %v2319_v44  ;;  %2141 = vmatprep.mubr.msk.f32.mxu0 %vm673_vm0, %v1230_v50 }
 0x3e2   : > { %2106 = vmatmul.mubr.msk.f32.vlgmr.msra.gmra.mrb[6].mxu1 %vm673_vm0, %v868_v61 }
 0x3e4   : > { %2142 = vmatmul.mubr.msk.f32.vlgmr.msra.gmra.mrb[8].mxu0 %vm673_vm0, %v1232_v53 }
 0x4af   : > { %v3085_v62 = vpop.f32.mrb[6].mxu0 }
 0x4b0   : > { %v3087_v63 = vpop.f32.mrb[7].mxu0 }
 0x4b5   : > { %v2107_v1 = vpop.f32.mrb[6].mxu1 }
 0x4b6   : > { %v947_v2 = vpop.f32.mrb[7].mxu1  ;;  %v953_v10 = vadd.f32 %v2107_v1, %v3053_v29 }
 0x4b7   : > { %v2143_v3 = vpop.f32.mrb[8].mxu0  ;;  %v948_v22 = vadd.f32 %v947_v2, %v3048_v27 }
 0x4b8   : > { %v1317_v4 = vadd.f32 %v2143_v3, %v3053_v29  ;;  %v1311_v5 = vpop.f32.mrb[9].mxu0  ;;  %v959_v11 = vsel %vm761_vm2, %v953_v10, -inf }
 0x4b9   : > { %v1312_v6 = vadd.f32 %v1311_v5, %v3048_v27  ;;  %v956_v23 = vsel %vm761_vm2, %v948_v22, -inf }
 0x4ba   : > { %v1323_v8 = vsel %vm761_vm2, %v1317_v4, -inf }
 0x4bb   : > { %1324 = vmax.xlane.f32.xlu1 %v1323_v8  ;;  %v1320_v9 = vsel %vm761_vm2, %v1312_v6, -inf }
 0x4bc   : > { %1321 = vmax.xlane.f32.xlu0 %v1320_v9  ;;  %v414_v9 = vld [vmem:[#allocation7 + $0x20] sm:$0xff] }
 0x4cc   : > { %2474 = vrot.lane.b32.xlu1 %v3037_v26, %s2750_s10 }
 0x4d0   : > { %1512 = vrot.lane.b32.xlu1 %v3021_v7, %s2750_s10 }
 0x4d4   : > { %1514 = vrot.lane.b32.xlu1 %v3029_v15, %s2750_s10 }
 0x4f8   : > { %960 = vmax.xlane.f32.xlu1 %v959_v11  ;;  %v416_v11 = vld [vmem:[#allocation7 + $0x30] sm:$0xff] }
 0x548   : > { %v1325_v12 = vpop.xlane.xlu1 %1324 }
 0x549   : > { %v1327_v14 = vsub.f32 %v1317_v4, %v1325_v12  ;;  %v1322_v16 = vpop.xlane.xlu0 %1321 }
 0x54a   : > { %v1326_v17 = vsub.f32 %v1312_v6, %v1322_v16 }
 0x54b   : > { %v1330_v18 = vmul.f32 1.442695, %v1327_v14  ;;  %v417_v14 = vld [vmem:[#allocation7 + $0x38] sm:$0xff] }
 0x54c   : > { %v1328_v19 = vmul.f32 1.442695, %v1326_v17  ;;  %v2475_v28 = vpop.permute.xlu1 %2474  ;;  %v2307_v16 = vpack.c.bf16 %v417_v14, %v416_v11  ;;  %v410_v17 = vld [vmem:[#allocation7] sm:$0xff] }
 0x54d   : > { %2496 = vpow2.f32 %v1330_v18  ;;  %v2477_v31 = vunpack.i.h.bf16 %v2475_v28  ;;  %v2476_v32 = vunpack.i.l.bf16 %v2475_v28  ;;  %v412_v28 = vld [vmem:[#allocation7 + $0x10] sm:$0xff] }
 0x54e   : > { %2498 = vpow2.f32 %v1328_v19 }
 0x54f   : > { %v2337_v36 = vpack.c.bf16 %v2477_v31, %v2476_v32 }
 0x550   : > { %v1513_v41 = vpop.permute.xlu1 %1512 }
 0x554   : > { %v1515_v42 = vpop.permute.xlu1 %1514 }
 0x557   : > { %v2497_v20 = vpop.eup %2496 }
 0x558   : > { %v1335_v21 = vsel %vm761_vm2, %v2497_v20, 0.0  ;;  %v2499_v7 = vpop.eup %2498 }
 0x559   : > { %1336 = vadd.xlane.f32.xlu0 %v1335_v21  ;;  %v1332_v15 = vsel %vm761_vm2, %v2499_v7, 0.0 }
 0x55d   : > { %1333 = vadd.xlane.f32.xlu0 %v1332_v15 }
 0x573   : > { %2469 = vrot.lane.b32.xlu0 %v3023_v13, %s2748_s27  ;;  %s2662_s27 = scalar_lea.vmem %s3147_s11, 256 }
 0x574   : > { %p2663_p8 = scmp.ne.s32.totalorder %s3147_s11, %s2662_s27  ;;  %p2670_p7 = scmp.lt.s32.totalorder %s2668_s29, %s2662_s27 }
 0x576   : > { %p2664_p10 = pnand %p2663_p8, %p2940_p6  ;;  %p2671_p9 = por %p2670_p7, %p2669_p3 }
 0x578   : > { %p2665_p12 = pneg %p2664_p10 }
 0x57a   : > { %p2672_p13 = pnand %p2671_p9, %p2665_p12 }
 0x585   : > { %v961_v43 = vpop.xlane.xlu1 %960 }
 0x586   : > { %v963_v44 = vsub.f32 %v953_v10, %v961_v43  ;;  %v415_v10 = vld [vmem:[#allocation7 + $0x28] sm:$0xff] }
 0x587   : > { %v2303_v12 = vpack.c.bf16 %v415_v10, %v414_v9 }
 0x588   : > { %v966_v47 = vmul.f32 1.442695, %v963_v44 }
 0x592   : > { %957 = vmax.xlane.f32.xlu0 %v956_v23 }
 0x5e6   : > { %v1337_v25 = vpop.xlane.xlu0 %1336 }
 0x5e7   : > { %2500 = vrcp.f32 %v1337_v25 }
 0x5ea   : > { %v1334_v26 = vpop.xlane.xlu0 %1333 }
 0x5eb   : > { %2502 = vrcp.f32 %v1334_v26 }
 0x5ee   : > { %v2470_v30 = vpop.permute.xlu0 %2469 }
 0x5ef   : > { %v2472_v33 = vunpack.i.h.bf16 %v2470_v30  ;;  %v2471_v34 = vunpack.i.l.bf16 %v2470_v30  ;;  %v413_v30 = vld [vmem:[#allocation7 + $0x18] sm:$0xff] }
 0x5f1   : > { %v2325_v35 = vpack.c.bf16 %v2472_v33, %v2471_v34  ;;  %v2501_v37 = vpop.eup %2500  ;;  %v2315_v33 = vpack.c.bf16 %v413_v30, %v412_v28  ;;  %v418_v34 = vld [vmem:[#allocation7 + $0x40] sm:$0xff] }
 0x5f2   : > { %v1341_v40 = vmul.f32 %v2501_v37, %v2497_v20  ;;  %v420_v37 = vld [vmem:[#allocation7 + $0x50] sm:$0xff] }
 0x5f3   : > { %2326 = vmatprep.subr.bf16.mxu0 %v2325_v35 }
 0x5f4   : > { %2328 = vmatpush3.bf16.msra.mxu0 %v2325_v35  ;;  %v419_v35 = vld [vmem:[#allocation7 + $0x48] sm:$0xff] }
 0x5f5   : > { %v2503_v38 = vpop.eup %2502  ;;  %2339 = vmatprep.subr.msk.bf16.mxu0 %vm3033_vm1, %v2337_v36 }
 0x5f6   : > { %v1340_v39 = vmul.f32 %v2503_v38, %v2499_v7  ;;  %v421_v38 = vld [vmem:[#allocation7 + $0x58] sm:$0xff] }
 0x5f8   : > { %2148 = vmatprep.mubr.msk.f32.mxu0 %vm761_vm2, %v1340_v39 }
 0x5f9   : > { %2149 = vmatmul.mubr.msk.f32.vlgmr.msra.gmra.mrb[10].mxu0 %vm761_vm2, %v1341_v40 }
 0x5fa   : > { %2166 = vmatprep.mubr.msk.f32.mxu0 %vm673_vm0, %v1513_v41  ;;  %v422_v41 = vld [vmem:[#allocation7 + $0x60] sm:$0xff] }
 0x5fd   : > { %2342 = vmatpush3.bf16.xpose.msk.msra.mxu0 %vm3033_vm1, %v2337_v36  ;;  %v2329_v36 = vpack.c.bf16 %v419_v35, %v418_v34 }
 0x604   : > { %2167 = vmatmul.mubr.msk.f32.vlgmr.msra.gmra.mrb[12].mxu0 %vm673_vm0, %v1515_v42  ;;  %v423_v42 = vld [vmem:[#allocation7 + $0x68] sm:$0xff] }
 0x61f   : > { %v958_v45 = vpop.xlane.xlu0 %957 }
 0x620   : > { %v962_v46 = vsub.f32 %v948_v22, %v958_v45 }
 0x622   : > { %v964_v48 = vmul.f32 1.442695, %v962_v46  ;;  %v2347_v46 = vpack.c.bf16 %v423_v42, %v422_v41 }
 0x624   : > { %2504 = vpow2.f32 %v964_v48  ;;  %v425_v48 = vld [vmem:[#allocation7 + $0x78] sm:$0xff] }
 0x625   : > { %2506 = vpow2.f32 %v966_v47  ;;  %v424_v47 = vld [vmem:[#allocation7 + $0x70] sm:$0xff] }
 0x62e   : > { %v2505_v49 = vpop.eup %2504 }
 0x62f   : > { %v968_v50 = vsel %vm761_vm2, %v2505_v49, 0.0  ;;  %v2507_v51 = vpop.eup %2506 }
 0x630   : > { %969 = vadd.xlane.f32.xlu0 %v968_v50  ;;  %v971_v52 = vsel %vm761_vm2, %v2507_v51, 0.0 }
 0x634   : > { %972 = vadd.xlane.f32.xlu0 %v971_v52  ;;  %v2351_v52 = vpack.c.bf16 %v425_v48, %v424_v47 }
 0x64a   : > { %2479 = vrot.lane.b32.xlu0 %v3023_v13, %s2749_s12 }
 0x6bd   : > { %v970_v24 = vpop.xlane.xlu0 %969 }
 0x6be   : > { %2508 = vrcp.f32 %v970_v24 }
 0x6c1   : > { %v973_v53 = vpop.xlane.xlu0 %972 }
 0x6c2   : > { %2510 = vrcp.f32 %v973_v53 }
 0x6c5   : > { %v2480_v54 = vpop.permute.xlu0 %2479 }
 0x6c6   : > { %v2482_v55 = vunpack.i.h.bf16 %v2480_v54  ;;  %v2481_v0 = vunpack.i.l.bf16 %v2480_v54 }
 0x6c8   : > { %v2509_v56 = vpop.eup %2508  ;;  %v2299_v57 = vpack.c.bf16 %v2482_v55, %v2481_v0 }
 0x6c9   : > { %v976_v58 = vmul.f32 %v2509_v56, %v2505_v49 }
 0x6ca   : > { %2300 = vmatprep.subr.bf16.mxu1 %v2299_v57 }
 0x6cb   : > { %2302 = vmatpush3.bf16.msra.mxu1 %v2299_v57  ;;  %2112 = vmatprep.mubr.msk.f32.mxu1 %vm761_vm2, %v976_v58 }
 0x6cc   : > { %v2511_v59 = vpop.eup %2510  ;;  %v3120_v60 = vpop.f32.mrb[10].mxu0  ;;  %2304 = vmatprep.subr.bf16.mxu1 %v2303_v12 }
 0x6cd   : > { %v977_v61 = vmul.f32 %v2511_v59, %v2507_v51  ;;  %v1420_v1 = vpop.f32.mrb[11].mxu0 }
 0x6cf   : > { %2113 = vmatmul.mubr.msk.f32.vlgmr.msra.gmra.mrb[8].mxu1 %vm761_vm2, %v977_v61 }
 0x6d0   : > { %2306 = vmatpush3.bf16.msra.mxu1 %v2303_v12 }
 0x6d1   : > { %2308 = vmatprep.subr.bf16.mxu1 %v2307_v16 }
 0x6d4   : > { %2310 = vmatpush3.bf16.msra.mxu1 %v2307_v16 }
 0x6d7   : > { %v2168_v2 = vpop.f32.mrb[12].mxu0 }
 0x6d8   : > { %v1594_v3 = vpop.f32.mrb[13].mxu0  ;;  %v1600_v5 = vadd.f32 %v2168_v2, %v3053_v29 }
 0x6d9   : > { %v1595_v4 = vadd.f32 %v1594_v3, %v3048_v27  ;;  %v411_v27 = vld [vmem:[#allocation7 + $0x8] sm:$0xff] }
 0x6da   : > { %v1606_v8 = vsel %vm761_vm2, %v1600_v5, -inf  ;;  %v2311_v18 = vpack.c.bf16 %v411_v27, %v410_v17 }
 0x6db   : > { %v1603_v6 = vsel %vm761_vm2, %v1595_v4, -inf }
 0x6dc   : > { %1604 = vmax.xlane.f32.xlu1 %v1603_v6  ;;  %2312 = vmatprep.subr.bf16.mxu1 %v2311_v18 }
 0x6e0   : > { %1607 = vmax.xlane.f32.xlu1 %v1606_v8 }
 0x769   : > { %v1605_v29 = vpop.xlane.xlu1 %1604 }
 0x76a   : > { %v1609_v19 = vsub.f32 %v1595_v4, %v1605_v29 }
 0x76c   : > { %v1611_v7 = vmul.f32 1.442695, %v1609_v19 }
 0x76d   : > { %v1608_v20 = vpop.xlane.xlu1 %1607 }
 0x76e   : > { %v1610_v21 = vsub.f32 %v1600_v5, %v1608_v20 }
 0x770   : > { %v1613_v15 = vmul.f32 1.442695, %v1610_v21 }
 0x772   : > { %2512 = vpow2.f32 %v1613_v15 }
 0x773   : > { %2514 = vpow2.f32 %v1611_v7 }
 0x77c   : > { %v2513_v22 = vpop.eup %2512 }
 0x77d   : > { %v1618_v23 = vsel %vm761_vm2, %v2513_v22, 0.0  ;;  %v2515_v25 = vpop.eup %2514 }
 0x77e   : > { %1619 = vadd.xlane.f32.xlu1 %v1618_v23  ;;  %v1615_v26 = vsel %vm761_vm2, %v2515_v25, 0.0 }
 0x782   : > { %1616 = vadd.xlane.f32.xlu1 %v1615_v26 }
 0x793   : > { %2484 = vrot.lane.b32.xlu1 %v3023_v13, %s2750_s10  ;;  %v2333_v13 = vpack.c.bf16 %v421_v38, %v420_v37 }
 0x7a2   : > { %v2114_v31 = vpop.f32.mrb[8].mxu1 }
 0x7a3   : > { %v1058_v32 = vpop.f32.mrb[9].mxu1 }
 0x7a4   : > { %2123 = vmatprep.mubr.msk.f32.mxu1 %vm673_vm0, %v1058_v32 }
 0x7a5   : > { %2124 = vmatmul.mubr.msk.f32.vlgmr.msra.gmra.mrb[10].mxu1 %vm673_vm0, %v2114_v31 }
 0x7a6   : > { %2314 = vmatpush3.bf16.msra.mxu1 %v2311_v18  ;;  %2134 = vmatprep.mubr.msk.f32.mxu1 %vm673_vm0, %v3087_v63 }
 0x7a7   : > { %2316 = vmatprep.subr.bf16.mxu1 %v2315_v33 }
 0x7aa   : > { %2318 = vmatpush3.bf16.msra.mxu1 %v2315_v33 }
 0x7ab   : > { %2330 = vmatprep.subr.bf16.mxu1 %v2329_v36 }
 0x7ad   : > { %2135 = vmatmul.mubr.msk.f32.vlgmr.msra.gmra.mrb[10].mxu1 %vm673_vm0, %v3085_v62 }
 0x7ae   : > { %2332 = vmatpush3.bf16.msra.mxu1 %v2329_v36  ;;  %2159 = vmatprep.mubr.msk.f32.mxu1 %vm673_vm0, %v1420_v1 }
 0x7af   : > { %2334 = vmatprep.subr.bf16.mxu1 %v2333_v13 }
 0x7b2   : > { %2336 = vmatpush3.bf16.msra.mxu1 %v2333_v13 }
 0x7b5   : > { %2160 = vmatmul.mubr.msk.f32.vlgmr.msra.gmra.mrb[10].mxu1 %vm673_vm0, %v3120_v60 }
 0x80b   : > { %v1620_v39 = vpop.xlane.xlu1 %1619 }
 0x80c   : > { %2516 = vrcp.f32 %v1620_v39 }
 0x80f   : > { %v1617_v63 = vpop.xlane.xlu1 %1616 }
 0x810   : > { %2518 = vrcp.f32 %v1617_v63 }
 0x813   : > { %v2485_v40 = vpop.permute.xlu1 %2484 }
 0x814   : > { %v2487_v43 = vunpack.i.h.bf16 %v2485_v40  ;;  %v2486_v44 = vunpack.i.l.bf16 %v2485_v40 }
 0x816   : > { %v2343_v45 = vpack.c.bf16 %v2487_v43, %v2486_v44  ;;  %v2517_v62 = vpop.eup %2516 }
 0x817   : > { %v1624_v51 = vmul.f32 %v2517_v62, %v2513_v22 }
 0x818   : > { %2344 = vmatprep.subr.bf16.mxu1 %v2343_v45 }
 0x819   : > { %2346 = vmatpush3.bf16.msra.mxu1 %v2343_v45 }
 0x81a   : > { %v2519_v49 = vpop.eup %2518  ;;  %2348 = vmatprep.subr.bf16.mxu1 %v2347_v46 }
 0x81b   : > { %v1623_v50 = vmul.f32 %v2519_v49, %v2515_v25 }
 0x81d   : > { %2173 = vmatprep.mubr.msk.f32.mxu1 %vm761_vm2, %v1623_v50 }
 0x81e   : > { %2174 = vmatmul.mubr.msk.f32.vlgmr.msra.gmra.mrb[12].mxu1 %vm761_vm2, %v1624_v51 }
 0x81f   : > { %2350 = vmatpush3.bf16.msra.mxu1 %v2347_v46 }
 0x820   : > { %2352 = vmatprep.subr.bf16.mxu1 %v2351_v52 }
 0x823   : > { %2354 = vmatpush3.bf16.msra.mxu1 %v2351_v52 }
 0x8f1   : > { %v2175_v24 = vpop.f32.mrb[12].mxu1 }
 0x8f2   : > { %v1703_v53 = vpop.f32.mrb[13].mxu1 }
 0x8f3   : > { %2184 = vmatprep.mubr.msk.f32.mxu1 %vm673_vm0, %v1703_v53 }
 0x8f4   : > { %2185 = vmatmul.mubr.msk.f32.vlgmr.msra.gmra.mrb[10].mxu1 %vm673_vm0, %v2175_v24 }
 0x9c7   : > { %v2186_v54 = vpop.f32.mrb[10].mxu1 }
 0x9c8   : > { %1796 = vst [vmem:[%s327_s15 + $0x8] sm:$0xff] %v2186_v54  ;;  %v1784_v55 = vpop.f32.mrb[11].mxu1 }
 0x9c9   : > { %1795 = vst [vmem:[%s327_s15] sm:$0xff] %v1784_v55 }
 0x9ca   : > { %2675 = shalt.err (!%p2672_p13)
}
 0x9cb   : > { %s2676_s20 = scalar_lea.hbm %s3152_s14, 256  ;;  %s2680_s12 = scalar_lea.hbm %s3202_s6, 512 }
 0x9cc   : > { %p2677_p0 = scmp.ne.s32.totalorder %s3152_s14, %s2676_s20  ;;  %p2681_p1 = scmp.lt.u32.totalorder %s3152_s14, %s3202_s6 }
 0x9cd   : > { %p2682_p2 = scmp.lt.u32.totalorder %s2680_s12, %s2676_s20  ;;  %p2684_p8 = scmp.lt.u32.totalorder %s2676_s20, %s3152_s14 }
 0x9ce   : > { %p2678_p5 = pnand %p2677_p0, %p2940_p6 }
 0x9cf   : > { %p2683_p4 = por %p2682_p2, %p2681_p1 }
 0x9d0   : > { %p2679_p11 = pneg %p2678_p5 }
 0x9d1   : > { %p2685_p10 = por %p2684_p8, %p2683_p4 }
 0x9d3   : > { %p2686_p12 = pnand %p2685_p10, %p2679_p11 }
 0x9d5   : > { %2689 = shalt.err (!%p2686_p12)
}
 0x9d6   : > { %s2752_s18 = smov 128   ;;  %s2753_s7 = smov 8  }
 0x9d7   : > { %2379 = dma.vmem_to_hbm [thread:$0]  (%p2940_p6), %s3147_s11, 256, %s3152_s14, %s1798_s19, %s2752_s18, %s2752_s18, %s2753_s7  }
 0x9d8 PF: > { %s3224_s13 = sld [smem:[#allocation16_spill]]  ;;  %s1826_s27 = sand.u32 1, %s2724_s21  }
 0x9d9   : > { %p3226_p7 = scmp.ge.s32.totalorder %s2736_s24, 2  ;;  %s1827_s25 = scalar_lea.sflag [#allocation4], %s1826_s27 }
 0x9de   : > { %p3225_p3 = scmp.ne.s32.totalorder %s3224_s13, 0 }
 0x9e0   : > { %p2399_p9 = pnand %p3226_p7, %p3225_p3 }
 0x9e2   : > { %2719 = dma.done.wait (!%p2399_p9), %s1827_s25, 256  }
 0x9e3   : > { %2721 = vsyncadd (!%p2399_p9), %s1827_s25, 4294967040  ;;  %p21_p13 = scmp.ge.s32.totalorder %s2930_s16, 4   ;;  %s3227_s21 = smov %s2728_s22 }
 0x9e4   : > { %s3228_s22 = smov %s2732_s23  ;;  %s3229_s23 = smov %s2946_s9 }
 0x9e5   : > { %s3230_s24 = smov %s2930_s16  ;;  %23 = sbr.rel (!%p21_p13) target bundleno = 7 (0x7), region = 105 }
 0x9ec   :  { %1832 = vsyncpa [#allocation3], 1 }
 0x9ed   :  { %1834 = vsyncpa [#allocation3 + $0x1], 1 }
 0x9ee   :  { %1835 = vsyncpa [#allocation6], 1 }
 0x9ef   :  { %1836 = vsyncpa [#allocation9], 1 }
 0x9f0   :  { %1837 = vsyncpa [#allocation4], 1 }
 0x9f1   :  { %1839 = vsyncpa [#allocation4 + $0x1], 1 }

</bundles_post_ra>
